<compile_context>
chip_gen: v6e
topology: v6e:2x2x1
jax: 0.10.0
libtpu: 0.0.40
codegen_flags: <defaults>
</compile_context>

<pallas_src>
import functools

import jax
import jax.numpy as jnp
from jax.experimental import pallas as pl
from jax.experimental.pallas import tpu as pltpu


# ----------------------------------------------------------------------------
# Fused kernel: all 1x1-conv layers chained (matmul + bias + ReLU) in VMEM.
# ----------------------------------------------------------------------------
def _fused_mlp_kernel(x_ref, *refs, n_layers):
    # x_ref: (1, C0, TL); refs = (w1, b1, w2, b2, ..., wN, bN, o_ref)
    # w_i: (C_i, C_{i-1});  b_i: (C_i, 1);  o_ref: (1, C_last, TL)
    o_ref = refs[-1]
    h = x_ref[0]  # (C0, TL) float32
    for i in range(n_layers):
        w = refs[2 * i][...]      # (C_out, C_in)
        b = refs[2 * i + 1][...]  # (C_out, 1) -> broadcasts over lanes (L)
        h = jnp.dot(w, h, preferred_element_type=jnp.float32) + b
        if i < n_layers - 1:      # activation after every layer except the last
            h = jnp.maximum(h, 0.0)
    o_ref[0] = h.astype(o_ref.dtype)


def _choose_l_tile(L):
    """Prefer a lane-dense tile (multiple of 128) that divides L, else full L."""
    if L % 128 == 0:
        for tl in (1024, 512, 256, 128):
            if L % tl == 0:
                return tl
    return L  # full-extent block is always legal


# ----------------------------------------------------------------------------
# MlpBlock1d forward pass (single fused pallas_call).
# ----------------------------------------------------------------------------
def mlp_block_1d(x_ncl, params):
    """
    x_ncl:  (B, C_in, L) float32  -- same layout as the PyTorch module (NCL).
    params: list of (w, b) with w: (C_out_i, C_in_i)  (Conv1d weight, squeezed),
            b: (C_out_i,).
    Returns (B, C_out_last, L).
    """
    B, C0, L = x_ncl.shape
    n_layers = len(params)
    channels = [C0] + [w.shape[0] for (w, _) in params]
    c_last = channels[-1]

    TL = _choose_l_tile(L)
    n_l_tiles = L // TL

    # Flatten params into the pallas_call arg list; biases become (C_out, 1)
    # so they broadcast over the lane (L) axis inside the kernel.
    flat_inputs = [x_ncl]
    in_specs = [pl.BlockSpec((1, C0, TL), lambda b, l: (b, 0, l))]
    for (w, bias) in params:
        c_out, c_in = w.shape
        flat_inputs.append(w)
        flat_inputs.append(bias.reshape(c_out, 1))
        # Weights / biases: full-array blocks, constant index_map -> stay resident.
        in_specs.append(pl.BlockSpec((c_out, c_in), lambda b, l: (0, 0)))
        in_specs.append(pl.BlockSpec((c_out, 1), lambda b, l: (0, 0)))

    out_spec = pl.BlockSpec((1, c_last, TL), lambda b, l: (b, 0, l))

    # Cost hint + explicit VMEM budget (tiles are small; leave wide headroom,
    # safe even for v7x's 64 MiB physical VMEM).
    flops = 2 * B * L * sum(ci * co for ci, co in zip(channels[:-1], channels[1:]))
    weight_bytes = 4 * sum(ci * co + co for ci, co in zip(channels[:-1], channels[1:]))
    io_bytes = 4 * B * L * (C0 + c_last) + weight_bytes
    tile_bytes = 4 * TL * sum(channels)  # x tile + all intermediates + out tile
    vmem_limit = min(max(4 * tile_bytes + 2 * weight_bytes + (1 << 20), 8 << 20),
                     64 << 20)

    kernel = functools.partial(_fused_mlp_kernel, n_layers=n_layers)
    return pl.pallas_call(
        kernel,
        out_shape=jax.ShapeDtypeStruct((B, c_last, L), jnp.float32),
        grid=(B, n_l_tiles),
        in_specs=in_specs,
        out_specs=out_spec,
        compiler_params=pltpu.CompilerParams(
            dimension_semantics=("parallel", "parallel"),
            vmem_limit_bytes=int(vmem_limit),
        ),
        cost_estimate=pl.CostEstimate(
            flops=flops, transcendentals=0, bytes_accessed=io_bytes
        ),
    )(*flat_inputs)


# ----------------------------------------------------------------------------
# Deterministic parameter init (mirrors nn.init.xavier_uniform_ + zero bias).
# Weights are stored in Conv1d orientation (C_out, C_in) (kernel dim squeezed).
# ----------------------------------------------------------------------------
def init_params(key, list_of_features):
    params = []
    for i in range(len(list_of_features) - 1):
        c_in = list_of_features[i]
        c_out = list_of_features[i + 1]
        key, sub = jax.random.split(key)
        bound = (6.0 / (c_in + c_out)) ** 0.5  # xavier: fan_in=c_in, fan_out=c_out
        w = jax.random.uniform(
            sub, (c_out, c_in), minval=-bound, maxval=bound, dtype=jnp.float32
        )
        b = jnp.zeros((c_out,), dtype=jnp.float32)
        params.append((w, b))
    return params


if __name__ == "__main__":
    key = jax.random.PRNGKey(0)
    k_x, k_p = jax.random.split(key)

    # MlpBlock1d([4, 32, 32, 8]): 4->32 (relu), 32->32 (relu), 32->8 (linear)
    list_of_features = [4, 32, 32, 8]
    B, L = 2, 16
    x = jax.random.normal(k_x, (B, list_of_features[0], L), dtype=jnp.float32)

    params = init_params(k_p, list_of_features)

    out = mlp_block_1d(x, params)
    out = jax.block_until_ready(out)

    # Reference check in plain JAX (same math, NCL layout, no Pallas).
    ref = x
    for i, (w, b) in enumerate(params):
        ref = jnp.einsum("oc,bcl->bol", w, ref) + b[:, None]
        if i < len(params) - 1:
            ref = jnp.maximum(ref, 0.0)

    assert out.shape == (B, list_of_features[-1], L), out.shape
    assert jnp.allclose(out, ref, atol=1e-5, rtol=1e-5)
    print("KERNEL_OK")
</pallas_src>

<mosaic_0001>
module attributes {stable_mosaic.version = 11 : i64} {
  func.func @_fused_mlp_kernel(%arg0: i32, %arg1: i32, %arg2: memref<1x4x16xf32, #tpu.memory_space<vmem>>, %arg3: memref<32x4xf32, #tpu.memory_space<vmem>>, %arg4: memref<32x1xf32, #tpu.memory_space<vmem>>, %arg5: memref<32x32xf32, #tpu.memory_space<vmem>>, %arg6: memref<32x1xf32, #tpu.memory_space<vmem>>, %arg7: memref<8x32xf32, #tpu.memory_space<vmem>>, %arg8: memref<8x1xf32, #tpu.memory_space<vmem>>, %arg9: memref<1x8x16xf32, #tpu.memory_space<vmem>>) attributes {dimension_semantics = [#tpu.dimension_semantics<parallel>, #tpu.dimension_semantics<parallel>], iteration_bounds = array<i64: 2, 1>, scalar_prefetch = 0 : i64, scratch_operands = 0 : i64, tpu.core_type = #tpu.core_type<tc>, window_params = [{transform_indices = @transform_0, window_bounds = array<i64: 1, 4, 16>}, {pipeline_mode = #tpu.pipeline_mode<synchronous>, transform_indices = @transform_1, window_bounds = array<i64: 32, 4>}, {pipeline_mode = #tpu.pipeline_mode<synchronous>, transform_indices = @transform_2, window_bounds = array<i64: 32, 1>}, {pipeline_mode = #tpu.pipeline_mode<synchronous>, transform_indices = @transform_3, window_bounds = array<i64: 32, 32>}, {pipeline_mode = #tpu.pipeline_mode<synchronous>, transform_indices = @transform_4, window_bounds = array<i64: 32, 1>}, {pipeline_mode = #tpu.pipeline_mode<synchronous>, transform_indices = @transform_5, window_bounds = array<i64: 8, 32>}, {pipeline_mode = #tpu.pipeline_mode<synchronous>, transform_indices = @transform_6, window_bounds = array<i64: 8, 1>}, {transform_indices = @transform_7, window_bounds = array<i64: 1, 8, 16>}]} {
    %c0 = arith.constant 0 : index
    %c0_0 = arith.constant 0 : index
    %c0_1 = arith.constant 0 : index
    %0 = vector.load %arg2[%c0, %c0_0, %c0_1] : memref<1x4x16xf32, #tpu.memory_space<vmem>>, vector<1x4x16xf32>
    %1 = vector.shape_cast %0 : vector<1x4x16xf32> to vector<4x16xf32>
    %c0_2 = arith.constant 0 : index
    %c0_3 = arith.constant 0 : index
    %2 = vector.load %arg3[%c0_2, %c0_3] : memref<32x4xf32, #tpu.memory_space<vmem>>, vector<32x4xf32>
    %c0_4 = arith.constant 0 : index
    %c0_5 = arith.constant 0 : index
    %3 = vector.load %arg4[%c0_4, %c0_5] : memref<32x1xf32, #tpu.memory_space<vmem>>, vector<32x1xf32>
    %cst = arith.constant dense<0.000000e+00> : vector<32x16xf32>
    %4 = tpu.matmul %2, %1, %cst {dimension_numbers = #tpu.dot_dimension_numbers<[1], [0], [0], [1], [0, 0, 1, 1], [], []>} : vector<32x4xf32>, vector<4x16xf32>, vector<32x16xf32> -> vector<32x16xf32>
    %5 = vector.broadcast %3 : vector<32x1xf32> to vector<32x16xf32>
    %6 = arith.addf %4, %5 : vector<32x16xf32>
    %cst_6 = arith.constant 0.000000e+00 : f32
    %7 = vector.broadcast %cst_6 : f32 to vector<32x16xf32>
    %8 = arith.maximumf %6, %7 : vector<32x16xf32>
    %c0_7 = arith.constant 0 : index
    %c0_8 = arith.constant 0 : index
    %9 = vector.load %arg5[%c0_7, %c0_8] : memref<32x32xf32, #tpu.memory_space<vmem>>, vector<32x32xf32>
    %c0_9 = arith.constant 0 : index
    %c0_10 = arith.constant 0 : index
    %10 = vector.load %arg6[%c0_9, %c0_10] : memref<32x1xf32, #tpu.memory_space<vmem>>, vector<32x1xf32>
    %cst_11 = arith.constant dense<0.000000e+00> : vector<32x16xf32>
    %11 = tpu.matmul %9, %8, %cst_11 {dimension_numbers = #tpu.dot_dimension_numbers<[1], [0], [0], [1], [0, 0, 1, 1], [], []>} : vector<32x32xf32>, vector<32x16xf32>, vector<32x16xf32> -> vector<32x16xf32>
    %12 = vector.broadcast %10 : vector<32x1xf32> to vector<32x16xf32>
    %13 = arith.addf %11, %12 : vector<32x16xf32>
    %cst_12 = arith.constant 0.000000e+00 : f32
    %14 = vector.broadcast %cst_12 : f32 to vector<32x16xf32>
    %15 = arith.maximumf %13, %14 : vector<32x16xf32>
    %c0_13 = arith.constant 0 : index
    %c0_14 = arith.constant 0 : index
    %16 = vector.load %arg7[%c0_13, %c0_14] : memref<8x32xf32, #tpu.memory_space<vmem>>, vector<8x32xf32>
    %c0_15 = arith.constant 0 : index
    %c0_16 = arith.constant 0 : index
    %17 = vector.load %arg8[%c0_15, %c0_16] : memref<8x1xf32, #tpu.memory_space<vmem>>, vector<8x1xf32>
    %cst_17 = arith.constant dense<0.000000e+00> : vector<8x16xf32>
    %18 = tpu.matmul %16, %15, %cst_17 {dimension_numbers = #tpu.dot_dimension_numbers<[1], [0], [0], [1], [0, 0, 1, 1], [], []>} : vector<8x32xf32>, vector<32x16xf32>, vector<8x16xf32> -> vector<8x16xf32>
    %19 = vector.broadcast %17 : vector<8x1xf32> to vector<8x16xf32>
    %20 = arith.addf %18, %19 : vector<8x16xf32>
    %c0_18 = arith.constant 0 : index
    %c0_19 = arith.constant 0 : index
    %c0_20 = arith.constant 0 : index
    %21 = vector.load %arg9[%c0_18, %c0_19, %c0_20] : memref<1x8x16xf32, #tpu.memory_space<vmem>>, vector<1x8x16xf32>
    %22 = vector.shape_cast %21 : vector<1x8x16xf32> to vector<8x16xf32>
    %23 = vector.shape_cast %20 : vector<8x16xf32> to vector<1x8x16xf32>
    tpu.vector_store %arg9[%c0_18, %c0_19, %c0_20], %23 {strides = array<i32>} : memref<1x8x16xf32, #tpu.memory_space<vmem>>, vector<1x8x16xf32>,
    return
  }
  func.func @transform_0(%arg0: i32, %arg1: i32) -> (i32, i32, i32) {
    %c0_i32 = arith.constant 0 : i32
    %c0_i32_0 = arith.constant 0 : i32
    return %arg0, %c0_i32, %arg1 : i32, i32, i32
  }
  func.func @transform_1(%arg0: i32, %arg1: i32) -> (i32, i32) {
    %c0_i32 = arith.constant 0 : i32
    %c0_i32_0 = arith.constant 0 : i32
    %c0_i32_1 = arith.constant 0 : i32
    return %c0_i32, %c0_i32_0 : i32, i32
  }
  func.func @transform_2(%arg0: i32, %arg1: i32) -> (i32, i32) {
    %c0_i32 = arith.constant 0 : i32
    %c0_i32_0 = arith.constant 0 : i32
    %c0_i32_1 = arith.constant 0 : i32
    return %c0_i32, %c0_i32_0 : i32, i32
  }
  func.func @transform_3(%arg0: i32, %arg1: i32) -> (i32, i32) {
    %c0_i32 = arith.constant 0 : i32
    %c0_i32_0 = arith.constant 0 : i32
    %c0_i32_1 = arith.constant 0 : i32
    return %c0_i32, %c0_i32_0 : i32, i32
  }
  func.func @transform_4(%arg0: i32, %arg1: i32) -> (i32, i32) {
    %c0_i32 = arith.constant 0 : i32
    %c0_i32_0 = arith.constant 0 : i32
    %c0_i32_1 = arith.constant 0 : i32
    return %c0_i32, %c0_i32_0 : i32, i32
  }
  func.func @transform_5(%arg0: i32, %arg1: i32) -> (i32, i32) {
    %c0_i32 = arith.constant 0 : i32
    %c0_i32_0 = arith.constant 0 : i32
    %c0_i32_1 = arith.constant 0 : i32
    return %c0_i32, %c0_i32_0 : i32, i32
  }
  func.func @transform_6(%arg0: i32, %arg1: i32) -> (i32, i32) {
    %c0_i32 = arith.constant 0 : i32
    %c0_i32_0 = arith.constant 0 : i32
    %c0_i32_1 = arith.constant 0 : i32
    return %c0_i32, %c0_i32_0 : i32, i32
  }
  func.func @transform_7(%arg0: i32, %arg1: i32) -> (i32, i32, i32) {
    %c0_i32 = arith.constant 0 : i32
    %c0_i32_0 = arith.constant 0 : i32
    return %arg0, %c0_i32, %arg1 : i32, i32, i32
  }
}

</mosaic_0001>

<bundles_post_ra>
// kernel: tpu_custom_call.1
= control target key start
LH: loop header
LB: loop body
LE: loop exit
PB: predicated region body
PF: predicated region fallthrough
CT: control target
= control target key end

     0   :  { %12 = vsyncpa [#allocation3], 0  ;;  %s1154_s0 = inlined_call_operand.vmem [shape: f32[2,4,16], index: 0, kind: input, shape index: {}]   ;;  %s1155_s1 = inlined_call_operand.vmem [shape: f32[32,4], index: 1, kind: input, shape index: {}]   ;;  %s1156_s2 = inlined_call_operand.vmem [shape: f32[32,1], index: 2, kind: input, shape index: {}]   ;;  %s1157_s3 = inlined_call_operand.vmem [shape: f32[32,32], index: 3, kind: input, shape index: {}]   ;;  %s1158_s4 = inlined_call_operand.vmem [shape: f32[32,1], index: 4, kind: input, shape index: {}]   ;;  %s1159_s5 = inlined_call_operand.vmem [shape: f32[8,32], index: 5, kind: input, shape index: {}]   ;;  %s1160_s6 = inlined_call_operand.vmem [shape: f32[8,1], index: 6, kind: input, shape index: {}]   ;;  %s1161_s7 = inlined_call_operand.hbm [shape: f32[2,8,16], index: 7, kind: output, shape index: {}]  }
   0x1   :  { %14 = vsyncpa [#allocation3 + $0x1], 0  ;;  %s986_s24 = smov 0   ;;  %s988_s25 = smov 0  }
   0x2   :  { %s990_s26 = smov 0   ;;  %s992_s27 = smov 0  }
   0x3   :  { %s994_s28 = smov 0   ;;  %s996_s29 = smov 0  }
   0x4 LB: > { %s732_s30 = sadd.s32 4294967295, %s940_s29   ;;  %s733_s8 = sadd.s32 4294967294, %s940_s29   ;;  %s940_s29 = sphi %s996_s29, %s20_s29   ;;  %s936_s28 = sphi %s994_s28, %s1168_s28   ;;  %s932_s27 = sphi %s992_s27, %s1167_s27   ;;  %s928_s26 = sphi %s990_s26, %s1166_s26   ;;  %s924_s25 = sphi %s988_s25, %s1165_s25   ;;  %s920_s24 = sphi %s986_s24, %s1164_s24  }
   0x5   : > { %s32_s9 = sadd.s32 1, %s936_s28  ;;  %s195_s10 = sadd.s32 1, %s928_s26 }
   0x6   : > { %p34_p0 = scmp.ge.s32.totalorder %s32_s9, 2  ;;  %p205_p1 = scmp.ne.s32.totalorder %s928_s26, %s924_s25 }
   0x7   : > { %p206_p2 = scmp.eq.s32.totalorder %s732_s30, 1  ;;  %p211_p3 = scmp.ne.s32.totalorder %s924_s25, %s920_s24 }
   0x8   : > { %s1170_s9 = smov (%p34_p0, %s32_s9), 0  ;;  %p212_p5 = scmp.eq.s32.totalorder %s733_s8, 1 }
   0x9   : > { %p1026_p4 = por %p206_p2, %p205_p1  ;;  %s190_s12 = ssub.s32 %s936_s28, %s1170_s9 }
   0xa   : > { %p736_p6 = scmp.ge.s32.totalorder %s940_s29, 1  ;;  %p193_p7 = scmp.eq.s32.totalorder %s190_s12, 0 }
   0xb   : > { %p1033_p8 = por %p212_p5, %p211_p3  ;;  %p258_p9 = scmp.lt.s32.totalorder %s940_s29, 3 }
   0xc   : > { %s1039_s14 = scalar_select %p193_p7, %s928_s26, %s195_s10  }
   0xd   : > { %p259_p10 = pnand %p736_p6, %p258_p9 }
   0xe   : > { %p292_p11 = scmp.lt.s32.totalorder (!%p259_p10), %s932_s27, 1  ;;  %s289_s17 = sand.u32 (!%p259_p10), 1, %s924_s25  }
   0xf   : > { %262 = sbr.rel (%p259_p10) target bundleno = 652 (0x28c), region = 48  ;;  %s737_s18 = sshll.u32 (!%p259_p10), %s289_s17, 3 }
  0x10   : > { %s291_s20 = scalar_lea.vmem (!%p259_p10), [#allocation2], %s737_s18  ;;  %s647_s8 = scalar_lea.sflag (!%p259_p10), [#allocation3], %s289_s17 }
  0x11   : > { %s661_s21 = sshll.u32 (!%p259_p10), %s291_s20, 4  ;;  %s662_s21 = int_to_ptr.vmem [resolvable:$true] %s661_s21 }
  0x12   : > { %s864_s10 = scalar_lea.vmem (!%p259_p10), %s662_s21, 128 }
  0x13   : > { %p865_p12 = scmp.ne.s32.totalorder (!%p259_p10), %s662_s21, %s864_s10 }
  0x14   : > { %v300_v0 = vld [vmem:[%s1155_s1] sm:$0xff]  ;;  %vm328_vm0 = vcmask 31744   ;;  %v307_v1 = vld [vmem:[%s1156_s2 + $0x18] sm:$0xff]  ;;  %s293_s19 = scalar_select %p292_p11, %s932_s27, 1  ;;  %v942_v2 = vmov 0   ;;  %v305_v3 = vld [vmem:[%s1156_s2 + $0x8] sm:$0xff] }
  0x15   : > { %773 = vmatprep.mubr.msk.f32.mxu0 %vm328_vm0, %v300_v0  ;;  %862 = vset.pattern.permute.xlu0 %v942_v2  ;;  %vm341_vm1 = vcmask 1043456   ;;  %v306_v4 = vld [vmem:[%s1156_s2 + $0x10] sm:$0xff]  ;;  %v304_v5 = vld [vmem:[%s1156_s2] sm:$0xff]  ;;  %v301_v7 = vld [vmem:[%s1155_s1 + $0x8] sm:$0xff]  ;;  %vm462_vm2 = vcmask 261120   ;;  %v943_v35 = vmov 0.0   ;;  %p866_p13 = pnand %p865_p12, %p1026_p4 }
  0x16   : > { %863 = vset.pattern.permute.xlu1 %v942_v2  ;;  %325 = vperm.xlu0 %862, %v307_v1   ;;  %s738_s22 = sshll.u32 %s293_s19, 2  ;;  %v302_v8 = vld [vmem:[%s1155_s1 + $0x10] sm:$0xff]  ;;  %v441_v9 = vld [vmem:[%s1158_s4 + $0x18] sm:$0xff]  ;;  %v439_v12 = vld [vmem:[%s1158_s4 + $0x8] sm:$0xff]  ;;  %vm944_vm3 = vmmov 0   ;;  %s750_s19 = sshll.u32 %s932_s27, 7 }
  0x17   : > { %315 = vperm.xlu1 %863, %v305_v3   ;;  %s298_s12 = scalar_lea.vmem %s1154_s0, %s738_s22  ;;  %v440_v10 = vld [vmem:[%s1158_s4 + $0x10] sm:$0xff]  ;;  %v303_v11 = vld [vmem:[%s1155_s1 + $0x18] sm:$0xff]  ;;  %v438_v13 = vld [vmem:[%s1158_s4] sm:$0xff]  ;;  %vm644_vm4 = vcmask 130048   ;;  %s1114_s30 = scalar_lea.hbm %s1161_s7, %s750_s19 }
  0x18   : > { %v299_v6 = vld [vmem:[%s298_s12] sm:$0xf]  ;;  %v435_v32 = vld [vmem:[%s1157_s3 + $0x8] sm:$0xff]  ;;  %v436_v33 = vld [vmem:[%s1157_s3 + $0x10] sm:$0xff]  ;;  %p867_p0 = pneg %p866_p13  ;;  %s945_s27 = smov [#allocation2]  }
  0x19   : > { %771 = vmatprep.subr.msk.mxu0 %vm341_vm1, %v299_v6  ;;  %v565_v14 = vld [vmem:[%s1160_s6] sm:$0xff]  ;;  %v437_v34 = vld [vmem:[%s1157_s3 + $0x18] sm:$0xff]  ;;  %s868_s12 = sshll.u32 %s945_s27, 4  ;;  %s869_s12 = int_to_ptr.vmem [resolvable:$false] %s868_s12 }
  0x1a   : > { %320 = vperm.xlu0 %862, %v306_v4   ;;  %772 = vmatpush3.msk.msra.mxu0 %vm341_vm1, %v299_v6  ;;  %v434_v15 = vld [vmem:[%s1157_s3] sm:$0xff]  ;;  %s870_s15 = scalar_lea.vmem %s869_s12, 256  ;;  %p871_p1 = scmp.lt.s32.totalorder %s662_s21, %s869_s12 }
  0x1b   : > { %310 = vperm.xlu1 %863, %v304_v5   ;;  %774 = vmatmul.mubr.msk.f32.vlgmr.msra.gmra.mxu0 %vm328_vm0, %v301_v7  ;;  %v564_v52 = vld [vmem:[%s1159_s5] sm:$0xff]  ;;  %p872_p2 = scmp.lt.s32.totalorder %s870_s15, %s864_s10 }
  0x1c   : > { %776 = vmatprep.mubr.msk.f32.mxu0 %vm328_vm0, %v302_v8  ;;  %787 = vmatprep.mubr.msk.f32.mxu1 %vm462_vm2, %v434_v15 }
  0x1d   : > { %793 = vmatprep.subr.mxu0 %v943_v35  ;;  %p873_p3 = por %p872_p2, %p871_p1 }
  0x1e   : > { %459 = vperm.xlu0 %862, %v441_v9  }
  0x1f   : > { %454 = vperm.xlu1 %863, %v440_v10   ;;  %777 = vmatmul.mubr.msk.f32.gmra.mxu0 %vm328_vm0, %v303_v11  ;;  %p874_p5 = pnand %p873_p3, %p867_p0 }
  0x20   : > { %801 = vmatprep.mubr.msk.f32.mxu0 %vm944_vm3, %v943_v35 }
  0x22   : > { %449 = vperm.xlu0 %862, %v439_v12  }
  0x23   : > { %444 = vperm.xlu1 %863, %v438_v13  }
  0x26   : > { %568 = vperm.xlu0 %862, %v565_v14  }
  0x91   : > { %v326_v16 = vpop.permute.xlu0 %325 }
  0x92   : > { %v316_v18 = vpop.permute.xlu1 %315 }
  0x95   : > { %v321_v22 = vpop.permute.xlu0 %320 }
  0x96   : > { %v311_v27 = vpop.permute.xlu1 %310 }
  0x99   : > { %v460_v36 = vpop.permute.xlu0 %459 }
  0x9a   : > { %v455_v38 = vpop.permute.xlu1 %454 }
  0x9d   : > { %v450_v42 = vpop.permute.xlu0 %449 }
  0x9e   : > { %v445_v47 = vpop.permute.xlu1 %444 }
  0xa1   : > { %v569_v53 = vpop.permute.xlu0 %568 }
  0xdb   : > { %v775_v17 = vpop.f32.mrf.mxu0 }
  0xdc   : > { %v417_v24 = vadd.f32 %v775_v17, %v316_v18 }
  0xdd   : > { %v411_v19 = vpop.f32.mrf.mxu0 }
  0xde   : > { %v412_v28 = vadd.f32 %v411_v19, %v311_v27  ;;  %v431_v30 = vmax.f32 %v417_v24, 0.0 }
  0xdf   : > { %v778_v20 = vpop.f32.mrf.mxu0 }
  0xe0   : > { %v427_v21 = vadd.f32 %v778_v20, %v326_v16  ;;  %v430_v31 = vmax.f32 %v412_v28, 0.0 }
  0xe1   : > { %v421_v23 = vpop.f32.mrf.mxu0 }
  0xe2   : > { %v433_v25 = vmax.f32 %v427_v21, 0.0  ;;  %v422_v26 = vadd.f32 %v421_v23, %v321_v22 }
  0xe4   : > { %v432_v29 = vmax.f32 %v422_v26, 0.0  ;;  %779 = vmatprep.subr.mxu1 %v433_v25 }
  0xe5   : > { %780 = vmatpush3.msra.mxu1 %v433_v25 }
  0xe6   : > { %781 = vmatprep.subr.mxu1 %v432_v29 }
  0xe7   : > { %782 = vmatpush3.msra.mxu1 %v432_v29 }
  0xe8   : > { %783 = vmatprep.subr.mxu1 %v431_v30 }
  0xe9   : > { %784 = vmatpush3.msra.mxu1 %v431_v30 }
  0xea   : > { %785 = vmatprep.subr.mxu1 %v430_v31 }
  0xeb   : > { %786 = vmatpush3.msra.mxu1 %v430_v31 }
  0xec   : > { %788 = vmatmul.mubr.msk.f32.vlgmr.msra.gmra.mxu1 %vm462_vm2, %v435_v32 }
  0xed   : > { %790 = vmatprep.mubr.msk.f32.mxu1 %vm462_vm2, %v436_v33 }
  0xf0   : > { %791 = vmatmul.mubr.msk.f32.gmra.mxu1 %vm462_vm2, %v437_v34 }
 0x1ac   : > { %v789_v37 = vpop.f32.mrf.mxu1 }
 0x1ad   : > { %v547_v44 = vadd.f32 %v789_v37, %v450_v42 }
 0x1ae   : > { %v541_v39 = vpop.f32.mrf.mxu1 }
 0x1af   : > { %v542_v48 = vadd.f32 %v541_v39, %v445_v47  ;;  %v561_v50 = vmax.f32 %v547_v44, 0.0 }
 0x1b0   : > { %v792_v40 = vpop.f32.mrf.mxu1 }
 0x1b1   : > { %v557_v41 = vadd.f32 %v792_v40, %v460_v36  ;;  %v560_v51 = vmax.f32 %v542_v48, 0.0 }
 0x1b2   : > { %v551_v43 = vpop.f32.mrf.mxu1 }
 0x1b3   : > { %v563_v45 = vmax.f32 %v557_v41, 0.0  ;;  %v552_v46 = vadd.f32 %v551_v43, %v455_v38 }
 0x1b5   : > { %v562_v49 = vmax.f32 %v552_v46, 0.0  ;;  %794 = vmatpush3.msra.mxu0 %v563_v45 }
 0x1b6   : > { %795 = vmatprep.subr.mxu0 %v943_v35 }
 0x1b7   : > { %796 = vmatpush3.msra.mxu0 %v562_v49 }
 0x1b8   : > { %797 = vmatprep.subr.mxu0 %v943_v35 }
 0x1b9   : > { %798 = vmatpush3.msra.mxu0 %v561_v50 }
 0x1ba   : > { %799 = vmatprep.subr.mxu0 %v943_v35 }
 0x1bb   : > { %800 = vmatpush3.msra.mxu0 %v560_v51 }
 0x1bc   : > { %802 = vmatmul.mubr.msk.f32.vlgmr.msra.gmra.mxu0 %vm462_vm2, %v564_v52 }
 0x27c   : > { %v640_v54 = vpop.f32.mrf.mxu0 }
 0x27d   : > { %v641_v55 = vadd.f32 %v640_v54, %v569_v53 }
 0x27e   : > { %v803_v56 = vpop.f32.mrf.mxu0 }
 0x27f   : > { %645 = vst.msk [vmem:[%s291_s20] sm:$0xff] %vm644_vm4, %v641_v55 }
 0x280   : > { %877 = shalt.err (!%p874_p5)
}
 0x281   : > { %s878_s16 = scalar_lea.hbm %s1114_s30, 128  ;;  %s882_s19 = scalar_lea.hbm %s1161_s7, 256 }
 0x282   : > { %p879_p6 = scmp.ne.s32.totalorder %s1114_s30, %s878_s16  ;;  %p883_p10 = scmp.lt.s32.totalorder %s1114_s30, %s1161_s7 }
 0x283   : > { %p884_p11 = scmp.lt.s32.totalorder %s882_s19, %s878_s16 }
 0x284   : > { %p880_p7 = pnand %p879_p6, %p1026_p4 }
 0x285   : > { %p885_p12 = por %p884_p11, %p883_p10 }
 0x286   : > { %p881_p9 = pneg %p880_p7 }
 0x288   : > { %p886_p13 = pnand %p885_p12, %p881_p9 }
 0x28a   : > { %889 = shalt.err (!%p886_p13)
}
 0x28b   : > { %804 = dma.vmem_to_hbm [thread:$0]  (%p1026_p4), %s662_s21, 128, %s1114_s30, %s647_s8  }
 0x28c PF: > { %p810_p0 = scmp.ge.s32.totalorder %s940_s29, 2  ;;  %s673_s22 = sand.u32 1, %s920_s24  }
 0x28d   : > { %s674_s10 = scalar_lea.sflag [#allocation3], %s673_s22 }
 0x28e   : > { %p807_p1 = pnand %p810_p0, %p1033_p8 }
 0x290   : > { %p808_p2 = pneg %p807_p1 }
 0x292   : > { %915 = dma.done.wait (%p808_p2), %s674_s10, 128  }
 0x293   : > { %917 = vsyncadd (%p808_p2), %s674_s10, 4294967168  ;;  %s20_s29 = sadd.s32 1, %s940_s29   ;;  %s1164_s24 = smov %s924_s25 }
 0x294   : > { %p17_p3 = scmp.ge.s32.totalorder %s20_s29, 4   ;;  %s1165_s25 = smov %s928_s26 }
 0x295   : > { %s1166_s26 = smov %s1039_s14  ;;  %s1167_s27 = smov %s936_s28 }
 0x296   : > { %s1168_s28 = smov %s1170_s9  ;;  %19 = sbr.rel (!%p17_p3) target bundleno = 4 (0x4), region = 83 }
 0x29b   :  { %679 = vsyncpa [#allocation3], 1 }
 0x29c   :  { %681 = vsyncpa [#allocation3 + $0x1], 1 }

</bundles_post_ra>
